<compile_context>
chip_gen: v5e
topology: v5e:2x2
jax: 0.10.0
libtpu: 0.0.40
codegen_flags: <defaults>
</compile_context>

<pallas_src>
import functools

import jax
import jax.numpy as jnp
import numpy as np
from jax.experimental import pallas as pl
from jax.experimental.pallas import tpu as pltpu

NEG_SLOPE = 0.2    # PyG GATConv leaky_relu negative_slope default
LN_EPS = 1e-5      # torch.nn.LayerNorm default eps
NEG_INF = -1e30

F_PAD = 128        # both GAT layers run on a lane-dense 128-wide feature slab
AUG = 128          # extra projection columns: col0 = a_src, col1 = a_dst, rest 0
MAX_TILE = 1024    # node tile (review: 1024-2048; 1024 is safe on all chips)
VMEM_LIMIT_BYTES = 48 * 1024 * 1024     # < v7x 64 MiB physical, > v5e 16 MiB default
RESIDENT_H_MAX_BYTES = 12 * 1024 * 1024  # keep h resident in VMEM when <= this


def _round_up(x, m):
    return (x + m - 1) // m * m


# --------------------------------------------------------------------------
# Kernel 1: node projection  h_aug = x @ W_aug   (tiled over node rows)
#           outputs: h (bf16, 128 lanes) and 2 f32 attention-logit columns
# --------------------------------------------------------------------------
def _proj_kernel(x_ref, w_ref, h_ref, aux_ref):
    x = x_ref[...].astype(jnp.bfloat16)
    haug = jnp.dot(x, w_ref[...], preferred_element_type=jnp.float32)
    h_ref[...] = haug[:, :F_PAD].astype(jnp.bfloat16)      # transformed features
    aux_ref[...] = haug[:, F_PAD:F_PAD + 2]                 # [a_src, a_dst] f32


def project(x, w_aug, tile_n):
    n_pad, fin = x.shape
    return pl.pallas_call(
        _proj_kernel,
        grid=(n_pad // tile_n,),
        in_specs=[
            pl.BlockSpec((tile_n, fin), lambda i: (i, 0)),
            pl.BlockSpec((fin, F_PAD + AUG), lambda i: (0, 0)),
        ],
        out_specs=(
            pl.BlockSpec((tile_n, F_PAD), lambda i: (i, 0)),
            pl.BlockSpec((tile_n, 2), lambda i: (i, 0)),
        ),
        out_shape=(
            jax.ShapeDtypeStruct((n_pad, F_PAD), jnp.bfloat16),
            jax.ShapeDtypeStruct((n_pad, 2), jnp.float32),
        ),
        compiler_params=pltpu.CompilerParams(dimension_semantics=("parallel",)),
    )(x, w_aug)


# --------------------------------------------------------------------------
# Kernel 2: GAT attention with online softmax over src blocks
#           + bias + ReLU + (masked) LayerNorm fused into the finalize step
# --------------------------------------------------------------------------
def _attn_kernel(adj_ref, h_ref, asrc_ref, adst_ref, bias_ref, gamma_ref,
                 beta_ref, o_ref, m_sc, l_sc, acc_sc,
                 *, f_valid, tile_n, h_resident):
    j = pl.program_id(1)

    @pl.when(j == 0)
    def _():
        m_sc[...] = jnp.full_like(m_sc, NEG_INF)
        l_sc[...] = jnp.zeros_like(l_sc)
        acc_sc[...] = jnp.zeros_like(acc_sc)

    mask = adj_ref[...].astype(jnp.float32) > 0.0           # [TD, TS]
    # e[i, j] = leaky_relu(a_dst[i] + a_src[j]) for edge j -> i
    e = adst_ref[...] + asrc_ref[...]                        # [TD,1] + [1,TS]
    e = jnp.maximum(e, NEG_SLOPE * e)                        # leaky_relu (2 VPU ops)
    e = jnp.where(mask, e, NEG_INF)

    m_prev = m_sc[...]
    m_new = jnp.maximum(m_prev, jnp.max(e, axis=-1, keepdims=True))
    c = jnp.exp(m_prev - m_new)
    # Diagonal (self-loop) src tile is processed first ((i+j)%nd rotation), so
    # m_new is finite from step 0 and exp(e_masked - m_new) underflows to an
    # exact 0.0 -> no second where() needed.
    p = jnp.exp(e - m_new)
    l_sc[...] = c * l_sc[...] + jnp.sum(p, axis=-1, keepdims=True)

    if h_resident:
        nd = pl.num_programs(1)
        jj = (pl.program_id(0) + j) % nd
        start = pl.multiple_of(jj * tile_n, tile_n)
        h_blk = h_ref[pl.ds(start, tile_n), :]
    else:
        h_blk = h_ref[...]
    acc_sc[...] = c * acc_sc[...] + jnp.dot(
        p.astype(jnp.bfloat16), h_blk, preferred_element_type=jnp.float32)
    m_sc[...] = m_new

    @pl.when(j == pl.num_programs(1) - 1)
    def _():
        # every row has >=1 unmasked entry (self-loops, also on padded rows)
        inv_l = 1.0 / l_sc[...]                              # exact per-row scale
        out = acc_sc[...] * inv_l + bias_ref[...]
        out = jnp.maximum(out, 0.0)                          # ReLU; dropout p=0 = id
        if f_valid == F_PAD:
            mu = jnp.mean(out, axis=-1, keepdims=True)
            d = out - mu
            var = jnp.mean(d * d, axis=-1, keepdims=True)
        else:
            # LayerNorm statistics over the real f_valid lanes only
            lane = jax.lax.broadcasted_iota(jnp.int32, out.shape, 1)
            valid = lane < f_valid
            outv = jnp.where(valid, out, 0.0)
            mu = jnp.sum(outv, axis=-1, keepdims=True) * (1.0 / f_valid)
            dv = jnp.where(valid, out - mu, 0.0)
            var = jnp.sum(dv * dv, axis=-1, keepdims=True) * (1.0 / f_valid)
        inv = jax.lax.rsqrt(var + LN_EPS)
        # gamma/beta are zero on padded lanes -> padded output lanes are 0
        o_ref[...] = ((out - mu) * inv * gamma_ref[...]
                      + beta_ref[...]).astype(o_ref.dtype)


def gat_attention(adj, h, a_src_row, a_dst_col, bias, gamma, beta,
                  f_valid, tile_n):
    n_pad = adj.shape[0]
    nd = n_pad // tile_n
    # keep the full bf16 src slab resident in VMEM when small enough
    h_resident = (n_pad * F_PAD * 2) <= RESIDENT_H_MAX_BYTES
    if h_resident:
        h_spec = pl.BlockSpec((n_pad, F_PAD), lambda i, j: (0, 0))
    else:
        h_spec = pl.BlockSpec((tile_n, F_PAD), lambda i, j: ((i + j) % nd, 0))

    kernel = functools.partial(_attn_kernel, f_valid=f_valid,
                               tile_n=tile_n, h_resident=h_resident)
    cost = pl.CostEstimate(
        flops=int(2 * n_pad * n_pad * F_PAD + 10 * n_pad * n_pad),
        transcendentals=int(n_pad * n_pad),
        bytes_accessed=int(n_pad * n_pad                      # int8 adjacency
                           + 2 * n_pad * F_PAD * 2            # h read + out write
                           + 16 * n_pad))

    return pl.pallas_call(
        kernel,
        grid=(nd, nd),
        in_specs=[
            # rotate src blocks so the diagonal (self-loop) tile comes first
            pl.BlockSpec((tile_n, tile_n), lambda i, j: (i, (i + j) % nd)),  # adj
            h_spec,                                                          # h src
            pl.BlockSpec((1, tile_n), lambda i, j: (0, (i + j) % nd)),       # a_src
            pl.BlockSpec((tile_n, 1), lambda i, j: (i, 0)),                  # a_dst
            pl.BlockSpec((1, F_PAD), lambda i, j: (0, 0)),                   # bias
            pl.BlockSpec((1, F_PAD), lambda i, j: (0, 0)),                   # gamma
            pl.BlockSpec((1, F_PAD), lambda i, j: (0, 0)),                   # beta
        ],
        out_specs=pl.BlockSpec((tile_n, F_PAD), lambda i, j: (i, 0)),
        out_shape=jax.ShapeDtypeStruct((n_pad, F_PAD), jnp.bfloat16),
        scratch_shapes=[
            pltpu.VMEM((tile_n, 1), jnp.float32),        # running max
            pltpu.VMEM((tile_n, 1), jnp.float32),        # running denom
            pltpu.VMEM((tile_n, F_PAD), jnp.float32),    # running numerator
        ],
        compiler_params=pltpu.CompilerParams(
            dimension_semantics=("parallel", "arbitrary"),
            vmem_limit_bytes=VMEM_LIMIT_BYTES),
        cost_estimate=cost,
    )(adj, h, a_src_row, a_dst_col, bias, gamma, beta)


# --------------------------------------------------------------------------
# Kernel 3: global mean pool (pool @ h, reduction over node tiles)
#           + linear + classify, all 128-lane padded
# --------------------------------------------------------------------------
def _head_kernel(pool_ref, h_ref, w1_ref, b1_ref, w2_ref, b2_ref, o_ref, acc_ref):
    k = pl.program_id(0)

    @pl.when(k == 0)
    def _():
        acc_ref[...] = jnp.zeros_like(acc_ref)

    acc_ref[...] += jnp.dot(pool_ref[...], h_ref[...],
                            preferred_element_type=jnp.float32)

    @pl.when(k == pl.num_programs(0) - 1)
    def _():
        g = jnp.dot(acc_ref[...].astype(jnp.bfloat16), w1_ref[...],
                    preferred_element_type=jnp.float32) + b1_ref[...]
        out = jnp.dot(g.astype(jnp.bfloat16), w2_ref[...],
                      preferred_element_type=jnp.float32) + b2_ref[...]
        o_ref[...] = out


def head(pool, h, w1, b1, w2, b2, tile_n):
    b_pad, n_pad = pool.shape
    return pl.pallas_call(
        _head_kernel,
        grid=(n_pad // tile_n,),
        in_specs=[
            pl.BlockSpec((b_pad, tile_n), lambda k: (0, k)),
            pl.BlockSpec((tile_n, F_PAD), lambda k: (k, 0)),
            pl.BlockSpec((F_PAD, F_PAD), lambda k: (0, 0)),
            pl.BlockSpec((1, F_PAD), lambda k: (0, 0)),
            pl.BlockSpec((F_PAD, F_PAD), lambda k: (0, 0)),
            pl.BlockSpec((1, F_PAD), lambda k: (0, 0)),
        ],
        out_specs=pl.BlockSpec((b_pad, F_PAD), lambda k: (0, 0)),
        out_shape=jax.ShapeDtypeStruct((b_pad, F_PAD), jnp.float32),
        scratch_shapes=[pltpu.VMEM((b_pad, F_PAD), jnp.float32)],
        compiler_params=pltpu.CompilerParams(dimension_semantics=("arbitrary",)),
    )(pool, h, w1, b1, w2, b2)


# --------------------------------------------------------------------------
# Parameter packing (plain-JAX glue)
# --------------------------------------------------------------------------
def _pad_cols(a, width):
    out = jnp.zeros(a.shape[:-1] + (width,), a.dtype)
    return out.at[..., :a.shape[-1]].set(a)


def _pad_mat(a, rows, cols):
    out = jnp.zeros((rows, cols), a.dtype)
    return out.at[:a.shape[0], :a.shape[1]].set(a)


def _make_layer_consts(w, att_src, att_dst, bias, gamma, beta):
    fin, fout = w.shape
    # fold the attention-vector reductions into the projection matmul
    a_src_col = w @ att_src.reshape(fout, 1)          # [fin, 1]
    a_dst_col = w @ att_dst.reshape(fout, 1)          # [fin, 1]
    w_pad = _pad_cols(w, F_PAD)                       # [fin, 128]
    aug = jnp.zeros((fin, AUG), jnp.float32)
    aug = aug.at[:, 0:1].set(a_src_col).at[:, 1:2].set(a_dst_col)
    w_aug = jnp.concatenate([w_pad, aug], axis=1).astype(jnp.bfloat16)  # [fin,256]
    return (w_aug, _pad_cols(bias, F_PAD), _pad_cols(gamma, F_PAD),
            _pad_cols(beta, F_PAD), fout)


# --------------------------------------------------------------------------
# Full model wrapper
# --------------------------------------------------------------------------
def bin_gat_conv_forward(x, edge_index, batch, params, n_graphs):
    n, fin = x.shape
    n_pad = _round_up(n, 128)
    tile_n = min(MAX_TILE, n_pad)
    n_pad = _round_up(n_pad, tile_n)

    # Dense int8 adjacency (adj[dst, src]) with self-loops (add_self_loops=True);
    # padded rows get only a self-loop so every softmax row has >=1 valid entry.
    # Built once, reused by both layers.
    # TODO(synk): for very large graphs replace this O(N^2) dense adjacency with
    #             a bit-packed mask or a scalar-prefetched CSR gather.
    src, dst = edge_index[0], edge_index[1]
    adj = jnp.zeros((n_pad, n_pad), jnp.int8).at[dst, src].set(1)
    diag = jnp.arange(n_pad)
    adj = adj.at[diag, diag].set(1)

    x_pad = jnp.zeros((n_pad, fin), jnp.float32).at[:n, :].set(x)

    h = x_pad
    layers = [
        (params["w1"], params["att_src1"], params["att_dst1"],
         params["bias1"], params["ln1_g"], params["ln1_b"]),
        (params["w2"], params["att_src2"], params["att_dst2"],
         params["bias2"], params["ln2_g"], params["ln2_b"]),
    ]
    for lp in layers:
        w_aug, bias_p, gamma_p, beta_p, f_valid = _make_layer_consts(*lp)
        h_bf, aux = project(h, w_aug, tile_n)
        a_src_row = aux[:, 0].reshape(1, n_pad)       # tiny (4*n_pad B) relayout
        a_dst_col = aux[:, 1:2]
        h = gat_attention(adj, h_bf, a_src_row, a_dst_col,
                          bias_p, gamma_p, beta_p, f_valid, tile_n)

    # global_mean_pool as a row-normalized membership matrix [B_pad, N_pad] (bf16)
    b_pad = _round_up(n_graphs, 8)
    batch_pad = jnp.full((n_pad,), -1, jnp.int32).at[:n].set(batch)
    one_hot = (batch_pad[None, :] == jnp.arange(b_pad)[:, None]).astype(jnp.float32)
    counts = jnp.maximum(one_hot.sum(axis=1, keepdims=True), 1.0)
    pool = (one_hot / counts).astype(jnp.bfloat16)

    lin_w = _pad_mat(params["lin_w"], F_PAD, F_PAD).astype(jnp.bfloat16)
    lin_b = _pad_cols(params["lin_b"], F_PAD)
    cls_w = _pad_mat(params["cls_w"], F_PAD, F_PAD).astype(jnp.bfloat16)
    cls_b = _pad_cols(params["cls_b"], F_PAD)

    out = head(pool, h, lin_w, lin_b, cls_w, cls_b, tile_n)
    n_classes = params["cls_w"].shape[1]
    result = out[:n_graphs, :n_classes]
    if n_classes == 1:                                # torch .squeeze(-1) semantics
        result = result[..., 0]
    return result


# --------------------------------------------------------------------------
# References for correctness checking
# --------------------------------------------------------------------------
def _bf(a):
    # round to bf16 and back -> exactly what the MXU sees as operands
    return a.astype(jnp.bfloat16).astype(jnp.float32)


def _dense_adj_f32(n, edge_index):
    src, dst = edge_index[0], edge_index[1]
    adj = jnp.zeros((n, n), jnp.float32).at[dst, src].set(1.0)
    return jnp.maximum(adj, jnp.eye(n, dtype=jnp.float32))


def reference_f32(x, edge_index, batch, params, n_graphs):
    """Faithful f32 emulation of the PyTorch module (GATConv heads=1)."""
    n = x.shape[0]
    adj = _dense_adj_f32(n, edge_index)

    def gat(xx, w, a_s, a_d, b, g, bt):
        h = xx @ w
        asrc = jnp.sum(h * a_s, -1, keepdims=True)
        adst = jnp.sum(h * a_d, -1, keepdims=True)
        e = adst + asrc.T
        e = jnp.where(e >= 0, e, NEG_SLOPE * e)
        e = jnp.where(adj > 0, e, NEG_INF)
        e = e - e.max(-1, keepdims=True)
        p = jnp.exp(e)
        alpha = p / p.sum(-1, keepdims=True)
        o = jnp.maximum(alpha @ h + b, 0.0)
        mu = o.mean(-1, keepdims=True)
        var = ((o - mu) ** 2).mean(-1, keepdims=True)
        return (o - mu) / jnp.sqrt(var + LN_EPS) * g + bt

    h = gat(x, params["w1"], params["att_src1"], params["att_dst1"],
            params["bias1"], params["ln1_g"], params["ln1_b"])
    h = gat(h, params["w2"], params["att_src2"], params["att_dst2"],
            params["bias2"], params["ln2_g"], params["ln2_b"])
    one_hot = (batch[None, :] == jnp.arange(n_graphs)[:, None]).astype(jnp.float32)
    pool = one_hot / jnp.maximum(one_hot.sum(1, keepdims=True), 1.0)
    g = pool @ h
    g = g @ params["lin_w"] + params["lin_b"]
    g = g @ params["cls_w"] + params["cls_b"]
    return g.squeeze(-1)


def reference_bf16_matched(x, edge_index, batch, params, n_graphs):
    """Same math as the kernels (identical bf16 operand rounding), plain JAX."""
    n = x.shape[0]
    adj = _dense_adj_f32(n, edge_index)

    def gat(xx, w, att_s, att_d, b, g, bt):
        fout = w.shape[1]
        xb = _bf(xx)
        h = xb @ _bf(w)
        asrc = xb @ _bf(w @ att_s.reshape(fout, 1))
        adst = xb @ _bf(w @ att_d.reshape(fout, 1))
        e = adst + asrc.T
        e = jnp.where(e >= 0, e, NEG_SLOPE * e)
        e = jnp.where(adj > 0, e, NEG_INF)
        m = e.max(-1, keepdims=True)
        p = jnp.where(adj > 0, jnp.exp(e - m), 0.0)
        l = p.sum(-1, keepdims=True)
        o = jnp.maximum((_bf(p) @ _bf(h)) / l + b, 0.0)
        mu = o.mean(-1, keepdims=True)
        var = ((o - mu) ** 2).mean(-1, keepdims=True)
        return (o - mu) * jax.lax.rsqrt(var + LN_EPS) * g + bt

    h = gat(x, params["w1"], params["att_src1"], params["att_dst1"],
            params["bias1"], params["ln1_g"], params["ln1_b"])
    h = gat(h, params["w2"], params["att_src2"], params["att_dst2"],
            params["bias2"], params["ln2_g"], params["ln2_b"])
    one_hot = (batch[None, :] == jnp.arange(n_graphs)[:, None]).astype(jnp.float32)
    pool = one_hot / jnp.maximum(one_hot.sum(1, keepdims=True), 1.0)
    g = _bf(pool) @ _bf(h)
    g = _bf(g) @ _bf(params["lin_w"]) + params["lin_b"]
    g = _bf(g) @ _bf(params["cls_w"]) + params["cls_b"]
    return g.squeeze(-1)


# --------------------------------------------------------------------------
# Deterministic parameter init + example inputs
# --------------------------------------------------------------------------
def init_params(key, embedding_size=32, n_classes=1):
    ks = jax.random.split(key, 12)
    p = {}
    p["w1"] = jax.random.normal(ks[0], (embedding_size, 128), jnp.float32) * 0.1
    p["att_src1"] = jax.random.normal(ks[1], (1, 128), jnp.float32) * 0.1
    p["att_dst1"] = jax.random.normal(ks[2], (1, 128), jnp.float32) * 0.1
    p["bias1"] = jnp.zeros((1, 128), jnp.float32)
    p["ln1_g"] = jnp.ones((1, 128), jnp.float32)
    p["ln1_b"] = jnp.zeros((1, 128), jnp.float32)
    p["w2"] = jax.random.normal(ks[3], (128, 64), jnp.float32) * 0.1
    p["att_src2"] = jax.random.normal(ks[4], (1, 64), jnp.float32) * 0.1
    p["att_dst2"] = jax.random.normal(ks[5], (1, 64), jnp.float32) * 0.1
    p["bias2"] = jnp.zeros((1, 64), jnp.float32)
    p["ln2_g"] = jnp.ones((1, 64), jnp.float32)
    p["ln2_b"] = jnp.zeros((1, 64), jnp.float32)
    p["lin_w"] = jax.random.normal(ks[6], (64, 64), jnp.float32) * 0.1
    p["lin_b"] = jnp.zeros((1, 64), jnp.float32)
    p["cls_w"] = jax.random.normal(ks[7], (64, n_classes), jnp.float32) * 0.1
    p["cls_b"] = jnp.zeros((1, n_classes), jnp.float32)
    return p


if __name__ == "__main__":
    key = jax.random.PRNGKey(0)
    k_x, k_p = jax.random.split(key)

    n_nodes = 16        # 2 graphs x 8 nodes
    n_graphs = 2
    embedding_size = 32

    # node features [N, embedding_size]
    x = jax.random.normal(k_x, (n_nodes, embedding_size), jnp.float32)

    # batch assignment: nodes 0..7 -> graph 0, nodes 8..15 -> graph 1
    batch = jnp.array([0] * 8 + [1] * 8, dtype=jnp.int32)

    # deterministic ring edges (both directions) within each graph, no self-loops
    srcs, dsts = [], []
    for g in range(n_graphs):
        off = g * 8
        for i in range(8):
            srcs += [off + i, off + (i + 1) % 8]
            dsts += [off + (i + 1) % 8, off + i]
    edge_index = jnp.array(np.stack([srcs, dsts]), dtype=jnp.int32)   # [2, 32]

    params = init_params(k_p, embedding_size=embedding_size, n_classes=1)

    out = bin_gat_conv_forward(x, edge_index, batch, params, n_graphs)
    out = jax.block_until_ready(out)
    assert out.shape == (n_graphs,)

    # Tight check: same math in plain JAX with identical bf16 operand rounding.
    ref_m = reference_bf16_matched(x, edge_index, batch, params, n_graphs)
    np.testing.assert_allclose(np.asarray(out), np.asarray(ref_m),
                               rtol=5e-3, atol=5e-3)

    # Sanity check vs the faithful f32 PyTorch-equivalent reference; tolerance
    # covers bf16 MXU operand rounding used throughout the kernels.
    ref32 = reference_f32(x, edge_index, batch, params, n_graphs)
    np.testing.assert_allclose(np.asarray(out), np.asarray(ref32),
                               rtol=1e-1, atol=1e-1)

    print("KERNEL_OK")
</pallas_src>

<mosaic_0001>
module attributes {stable_mosaic.version = 11 : i64} {
  func.func @_proj_kernel(%arg0: i32, %arg1: memref<128x32xf32, #tpu.memory_space<vmem>>, %arg2: memref<32x256xbf16, #tpu.memory_space<vmem>>, %arg3: memref<128x128xbf16, #tpu.memory_space<vmem>>, %arg4: memref<128x2xf32, #tpu.memory_space<vmem>>) attributes {dimension_semantics = [#tpu.dimension_semantics<parallel>], iteration_bounds = array<i64: 1>, scalar_prefetch = 0 : i64, scratch_operands = 0 : i64, tpu.core_type = #tpu.core_type<tc>, window_params = [{transform_indices = @transform_0, window_bounds = array<i64: 128, 32>}, {pipeline_mode = #tpu.pipeline_mode<synchronous>, transform_indices = @transform_1, window_bounds = array<i64: 32, 256>}, {transform_indices = @transform_2, window_bounds = array<i64: 128, 128>}, {transform_indices = @transform_3, window_bounds = array<i64: 128, 2>}]} {
    %c0 = arith.constant 0 : index
    %c0_0 = arith.constant 0 : index
    %0 = vector.load %arg1[%c0, %c0_0] : memref<128x32xf32, #tpu.memory_space<vmem>>, vector<128x32xf32>
    %1 = arith.truncf %0 : vector<128x32xf32> to vector<128x32xbf16>
    %c0_1 = arith.constant 0 : index
    %c0_2 = arith.constant 0 : index
    %2 = vector.load %arg2[%c0_1, %c0_2] : memref<32x256xbf16, #tpu.memory_space<vmem>>, vector<32x256xbf16>
    %cst = arith.constant dense<0.000000e+00> : vector<128x256xf32>
    %3 = tpu.matmul %1, %2, %cst {dimension_numbers = #tpu.dot_dimension_numbers<[1], [0], [0], [1], [0, 0, 1, 1], [], []>} : vector<128x32xbf16>, vector<32x256xbf16>, vector<128x256xf32> -> vector<128x256xf32>
    %4 = vector.extract_strided_slice %3 {offsets = [0, 0], sizes = [128, 128], strides = [1, 1]} : vector<128x256xf32> to vector<128x128xf32>
    %5 = arith.truncf %4 : vector<128x128xf32> to vector<128x128xbf16>
    %c0_3 = arith.constant 0 : index
    %c0_4 = arith.constant 0 : index
    %6 = vector.load %arg3[%c0_3, %c0_4] : memref<128x128xbf16, #tpu.memory_space<vmem>>, vector<128x128xbf16>
    tpu.vector_store %arg3[%c0_3, %c0_4], %5 {strides = array<i32>} : memref<128x128xbf16, #tpu.memory_space<vmem>>, vector<128x128xbf16>,
    %7 = vector.extract_strided_slice %3 {offsets = [0, 128], sizes = [128, 2], strides = [1, 1]} : vector<128x256xf32> to vector<128x2xf32>
    %c0_5 = arith.constant 0 : index
    %c0_6 = arith.constant 0 : index
    %8 = vector.load %arg4[%c0_5, %c0_6] : memref<128x2xf32, #tpu.memory_space<vmem>>, vector<128x2xf32>
    tpu.vector_store %arg4[%c0_5, %c0_6], %7 {strides = array<i32>} : memref<128x2xf32, #tpu.memory_space<vmem>>, vector<128x2xf32>,
    return
  }
  func.func @transform_0(%arg0: i32) -> (i32, i32) {
    %c0_i32 = arith.constant 0 : i32
    %c0_i32_0 = arith.constant 0 : i32
    return %arg0, %c0_i32 : i32, i32
  }
  func.func @transform_1(%arg0: i32) -> (i32, i32) {
    %c0_i32 = arith.constant 0 : i32
    %c0_i32_0 = arith.constant 0 : i32
    %c0_i32_1 = arith.constant 0 : i32
    return %c0_i32, %c0_i32_0 : i32, i32
  }
  func.func @transform_2(%arg0: i32) -> (i32, i32) {
    %c0_i32 = arith.constant 0 : i32
    %c0_i32_0 = arith.constant 0 : i32
    return %arg0, %c0_i32 : i32, i32
  }
  func.func @transform_3(%arg0: i32) -> (i32, i32) {
    %c0_i32 = arith.constant 0 : i32
    %c0_i32_0 = arith.constant 0 : i32
    return %arg0, %c0_i32 : i32, i32
  }
}

</mosaic_0001>

<bundles_post_ra>
// kernel: tpu_custom_call.1
= control target key start
LH: loop header
LB: loop body
LE: loop exit
PB: predicated region body
PF: predicated region fallthrough
CT: control target
= control target key end

     0   :  { %s551_s0 = inlined_call_operand.vmem [shape: f32[128,32], index: 0, kind: input, shape index: {}]   ;;  %s552_s1 = inlined_call_operand.vmem [shape: bf16[32,256], index: 1, kind: input, shape index: {}]   ;;  %s553_s2 = inlined_call_operand.hbm [shape: bf16[128,128], index: 2, kind: output, shape index: {0}]   ;;  %s554_s3 = inlined_call_operand.vmem [shape: f32[128,2], index: 3, kind: output, shape index: {1}]  }
   0x1   :  { %v267_v0 = vld [vmem:[%s552_s1 + $0x10] sm:$0xf]  ;;  %v292_v1 = vld [vmem:[%s552_s1 + $0x14] sm:$0xf0]  ;;  %v291_v2 = vld [vmem:[%s552_s1 + $0x14] sm:$0xf] }
   0x2   :  { %v268_v3 = vor.u32 %v292_v1, %v267_v0  ;;  %v269_v4 = vld [vmem:[%s552_s1 + $0x18] sm:$0xf0]  ;;  %v259_v5 = vld [vmem:[%s552_s1] sm:$0xf]  ;;  %v290_v6 = vld [vmem:[%s552_s1 + $0x4] sm:$0xf0] }
   0x3   :  { %v272_v7 = vor.u32 %v291_v2, %v269_v4  ;;  %v289_v8 = vld [vmem:[%s552_s1 + $0x4] sm:$0xf]  ;;  %v261_v9 = vld [vmem:[%s552_s1 + $0x8] sm:$0xf0]  ;;  %v260_v11 = vor.u32 %v290_v6, %v259_v5 }
   0x4   :  { %v15_v10 = vld [vmem:[%s551_s0] sm:$0xff]  ;;  %94 = vmatpush.bf16.msra.mxu0 %v268_v3  ;;  %340 = vmatpush.bf16.msra.mxu2 %v268_v3  ;;  %v16_v12 = vld [vmem:[%s551_s0 + $0x8] sm:$0xff]  ;;  %v264_v15 = vor.u32 %v289_v8, %v261_v9 }
   0x5   :  { %v23_v13 = vld [vmem:[%s551_s0 + $0x40] sm:$0xff]  ;;  %v24_v14 = vld [vmem:[%s551_s0 + $0x48] sm:$0xff]  ;;  %342 = vmatpush.bf16.msra.mxu3 %v272_v7  ;;  %143 = vmatpush.bf16.msra.mxu1 %v272_v7  ;;  %v31_v16 = vpack.c.bf16 %v16_v12, %v15_v10 }
   0x6   :  { %v35_v17 = vpack.c.bf16 %v24_v14, %v23_v13 }
   0x7   :  { %9 = vsyncpa [#allocation3], 0  ;;  %vm63_vm0 = vcmask 261120   ;;  %v17_v18 = vld [vmem:[%s551_s0 + $0x10] sm:$0xff]  ;;  %v18_v19 = vld [vmem:[%s551_s0 + $0x18] sm:$0xff]  ;;  %vm218_vm1 = vcmask 15360  }
   0x8   :  { %95 = vmatpush.bf16.msra.mxu0 %v260_v11  ;;  %341 = vmatpush.bf16.msra.mxu2 %v260_v11  ;;  %v25_v20 = vld [vmem:[%s551_s0 + $0x50] sm:$0xff]  ;;  %v26_v21 = vld [vmem:[%s551_s0 + $0x58] sm:$0xff]  ;;  %v32_v22 = vpack.c.bf16 %v18_v19, %v17_v18  ;;  %v19_v24 = vld [vmem:[%s551_s0 + $0x20] sm:$0xff]  ;;  %s373_s6 = smov [#allocation2]   ;;  %s241_s1 = sshll.u32 %s553_s2, 4  ;;  %s242_s1 = int_to_ptr.hbm [resolvable:$true] %s241_s1 }
   0x9   :  { %343 = vmatpush.bf16.msra.mxu3 %v264_v15  ;;  %144 = vmatpush.bf16.msra.mxu1 %v264_v15  ;;  %v36_v23 = vpack.c.bf16 %v26_v21, %v25_v20  ;;  %v20_v25 = vld [vmem:[%s551_s0 + $0x28] sm:$0xff]  ;;  %v27_v26 = vld [vmem:[%s551_s0 + $0x60] sm:$0xff]  ;;  %v21_v30 = vld [vmem:[%s551_s0 + $0x30] sm:$0xff]  ;;  %s374_s11 = smov 64   ;;  %s375_s12 = smov 4  }
   0xa   :  { %v28_v27 = vld [vmem:[%s551_s0 + $0x68] sm:$0xff]  ;;  %v33_v28 = vpack.c.bf16 %v20_v25, %v19_v24  ;;  %v22_v31 = vld [vmem:[%s551_s0 + $0x38] sm:$0xff]  ;;  %v29_v32 = vld [vmem:[%s551_s0 + $0x70] sm:$0xff] }
   0xb   :  { %273 = vmatmul.msk.bf16.vlgmr.msra.gmra.mxu0 %vm63_vm0, %v31_v16  ;;  %277 = vmatmul.msk.bf16.vlgmr.msra.gmra.mxu2 %vm63_vm0, %v35_v17  ;;  %v37_v29 = vpack.c.bf16 %v28_v27, %v27_v26  ;;  %v30_v33 = vld [vmem:[%s551_s0 + $0x78] sm:$0xff]  ;;  %v34_v34 = vpack.c.bf16 %v22_v31, %v21_v30  ;;  %s239_s0 = sshll.u32 %s373_s6, 4  ;;  %s240_s0 = int_to_ptr.vmem [resolvable:$true] %s239_s0 }
   0xc   :  { %285 = vmatmul.msk.bf16.vlgmr.msra.gmra.mxu3 %vm63_vm0, %v35_v17  ;;  %281 = vmatmul.msk.bf16.vlgmr.msra.gmra.mxu1 %vm63_vm0, %v31_v16  ;;  %v38_v35 = vpack.c.bf16 %v30_v33, %v29_v32 }
  0x1b   :  { %274 = vmatmul.msk.bf16.gmra.mxu0 %vm63_vm0, %v32_v22  ;;  %278 = vmatmul.msk.bf16.gmra.mxu2 %vm63_vm0, %v36_v23 }
  0x1c   :  { %286 = vmatmul.msk.bf16.gmra.mxu3 %vm63_vm0, %v36_v23  ;;  %282 = vmatmul.msk.bf16.gmra.mxu1 %vm63_vm0, %v32_v22 }
  0x2b   :  { %275 = vmatmul.msk.bf16.gmra.mxu0 %vm63_vm0, %v33_v28  ;;  %279 = vmatmul.msk.bf16.gmra.mxu2 %vm63_vm0, %v37_v29 }
  0x2c   :  { %287 = vmatmul.msk.bf16.gmra.mxu3 %vm63_vm0, %v37_v29  ;;  %283 = vmatmul.msk.bf16.gmra.mxu1 %vm63_vm0, %v33_v28 }
  0x3b   :  { %276 = vmatmul.msk.bf16.gmra.mxu0 %vm63_vm0, %v34_v34  ;;  %280 = vmatmul.msk.bf16.gmra.mxu2 %vm63_vm0, %v38_v35 }
  0x3c   :  { %288 = vmatmul.msk.bf16.gmra.mxu3 %vm63_vm0, %v38_v35  ;;  %284 = vmatmul.msk.bf16.gmra.mxu1 %vm63_vm0, %v34_v34 }
  0x88   :  { %v97_v36 = vpop.f32.mrf.mxu0 }
  0x89   :  { %v146_v37 = vpop.f32.mrf.mxu1 }
  0x8a   :  { %219 = vst.msk [vmem:[%s554_s3] sm:$0xff] %vm218_vm1, %v146_v37 }
  0x8e   :  { %v117_v38 = vpop.f32.mrf.mxu2 }
  0x8f   :  { %v166_v39 = vpop.f32.mrf.mxu3 }
  0x90   :  { %227 = vst.msk [vmem:[%s554_s3 + $0x40] sm:$0xff] %vm218_vm1, %v166_v39  ;;  %v99_v40 = vpop.f32.mrf.mxu0 }
  0x91   :  { %v296_v41 = vpack.c.bf16 %v99_v40, %v97_v36  ;;  %v148_v42 = vpop.f32.mrf.mxu1 }
  0x92   :  { %220 = vst.msk [vmem:[%s554_s3 + $0x8] sm:$0xff] %vm218_vm1, %v148_v42 }
  0x93   :  { %297 = vst [vmem:[#allocation2] sm:$0xff] %v296_v41  }
  0x96   :  { %v119_v43 = vpop.f32.mrf.mxu2 }
  0x97   :  { %v316_v44 = vpack.c.bf16 %v119_v43, %v117_v38  ;;  %v168_v45 = vpop.f32.mrf.mxu3 }
  0x98   :  { %228 = vst.msk [vmem:[%s554_s3 + $0x48] sm:$0xff] %vm218_vm1, %v168_v45  ;;  %v102_v46 = vpop.f32.mrf.mxu0 }
  0x99   :  { %336 = vst [vmem:[#allocation2 + $0x20] sm:$0xff] %v316_v44   ;;  %v151_v47 = vpop.f32.mrf.mxu1 }
  0x9a   :  { %221 = vst.msk [vmem:[%s554_s3 + $0x10] sm:$0xff] %vm218_vm1, %v151_v47 }
  0x9e   :  { %v122_v48 = vpop.f32.mrf.mxu2 }
  0x9f   :  { %v171_v49 = vpop.f32.mrf.mxu3 }
  0xa0   :  { %229 = vst.msk [vmem:[%s554_s3 + $0x50] sm:$0xff] %vm218_vm1, %v171_v49  ;;  %v104_v50 = vpop.f32.mrf.mxu0 }
  0xa1   :  { %v301_v51 = vpack.c.bf16 %v104_v50, %v102_v46  ;;  %v153_v52 = vpop.f32.mrf.mxu1 }
  0xa2   :  { %222 = vst.msk [vmem:[%s554_s3 + $0x18] sm:$0xff] %vm218_vm1, %v153_v52 }
  0xa3   :  { %333 = vst [vmem:[#allocation2 + $0x8] sm:$0xff] %v301_v51  }
  0xa6   :  { %v124_v53 = vpop.f32.mrf.mxu2 }
  0xa7   :  { %v321_v54 = vpack.c.bf16 %v124_v53, %v122_v48  ;;  %v173_v55 = vpop.f32.mrf.mxu3 }
  0xa8   :  { %230 = vst.msk [vmem:[%s554_s3 + $0x58] sm:$0xff] %vm218_vm1, %v173_v55  ;;  %v107_v56 = vpop.f32.mrf.mxu0 }
  0xa9   :  { %337 = vst [vmem:[#allocation2 + $0x28] sm:$0xff] %v321_v54   ;;  %v156_v57 = vpop.f32.mrf.mxu1 }
  0xaa   :  { %223 = vst.msk [vmem:[%s554_s3 + $0x20] sm:$0xff] %vm218_vm1, %v156_v57 }
  0xae   :  { %v127_v58 = vpop.f32.mrf.mxu2 }
  0xaf   :  { %v176_v59 = vpop.f32.mrf.mxu3 }
  0xb0   :  { %231 = vst.msk [vmem:[%s554_s3 + $0x60] sm:$0xff] %vm218_vm1, %v176_v59  ;;  %v109_v60 = vpop.f32.mrf.mxu0 }
  0xb1   :  { %v306_v61 = vpack.c.bf16 %v109_v60, %v107_v56  ;;  %v158_v62 = vpop.f32.mrf.mxu1 }
  0xb2   :  { %224 = vst.msk [vmem:[%s554_s3 + $0x28] sm:$0xff] %vm218_vm1, %v158_v62 }
  0xb3   :  { %334 = vst [vmem:[#allocation2 + $0x10] sm:$0xff] %v306_v61  }
  0xb6   :  { %v129_v63 = vpop.f32.mrf.mxu2 }
  0xb7   :  { %v326_v0 = vpack.c.bf16 %v129_v63, %v127_v58  ;;  %v178_v1 = vpop.f32.mrf.mxu3 }
  0xb8   :  { %232 = vst.msk [vmem:[%s554_s3 + $0x68] sm:$0xff] %vm218_vm1, %v178_v1  ;;  %v112_v2 = vpop.f32.mrf.mxu0 }
  0xb9   :  { %338 = vst [vmem:[#allocation2 + $0x30] sm:$0xff] %v326_v0   ;;  %v161_v3 = vpop.f32.mrf.mxu1 }
  0xba   :  { %225 = vst.msk [vmem:[%s554_s3 + $0x30] sm:$0xff] %vm218_vm1, %v161_v3 }
  0xbe   :  { %v132_v4 = vpop.f32.mrf.mxu2 }
  0xbf   :  { %v181_v5 = vpop.f32.mrf.mxu3 }
  0xc0   :  { %233 = vst.msk [vmem:[%s554_s3 + $0x70] sm:$0xff] %vm218_vm1, %v181_v5  ;;  %v114_v6 = vpop.f32.mrf.mxu0 }
  0xc1   :  { %v311_v7 = vpack.c.bf16 %v114_v6, %v112_v2  ;;  %v163_v8 = vpop.f32.mrf.mxu1 }
  0xc2   :  { %226 = vst.msk [vmem:[%s554_s3 + $0x38] sm:$0xff] %vm218_vm1, %v163_v8 }
  0xc3   :  { %335 = vst [vmem:[#allocation2 + $0x18] sm:$0xff] %v311_v7  }
  0xc6   :  { %v134_v9 = vpop.f32.mrf.mxu2 }
  0xc7   :  { %v331_v10 = vpack.c.bf16 %v134_v9, %v132_v4  ;;  %v183_v11 = vpop.f32.mrf.mxu3 }
  0xc8   :  { %234 = vst.msk [vmem:[%s554_s3 + $0x78] sm:$0xff] %vm218_vm1, %v183_v11 }
  0xc9   :  { %339 = vst [vmem:[#allocation2 + $0x38] sm:$0xff] %v331_v10  }
  0xca   :  { %247 = dma.vmem_to_hbm [thread:$0]  %s240_s0, 1024, %s242_s1, [#allocation3], %s374_s11, %s374_s11, %s375_s12  }
  0xcb   :  { %371 = dma.done.wait [#allocation3], 1024  }
  0xcc   :  { %372 = vsyncadd [#allocation3], 4294966272 }
  0xcd   :  { %256 = vsyncpa [#allocation3], 1 }

</bundles_post_ra>
